<compile_context>
chip_gen: v5e
topology: v5e:2x2
jax: 0.10.0
libtpu: 0.0.40
codegen_flags: <defaults>
</compile_context>

<pallas_src>
import jax
import jax.numpy as jnp
import numpy as np
from jax.experimental import pallas as pl
from jax.experimental.pallas import tpu as pltpu


def resnet_block_kernel(x_ref, w1_ref, s1_ref, b1_ref, w2_ref, s2_ref, b2_ref,
                        o_ref, xpad_ref, mid_ref):
    # x_ref    : (1, H, W*C)    bf16 input tile for this batch element
    # w*_ref   : (3, W*C, W*C)  bf16 banded conv weights (one slab per ky tap)
    # s*/b*    : (1, W*C)       f32 folded BatchNorm scale / bias (tiled over W)
    # o_ref    : (1, H, W*C)    bf16 output (lane-dense slab)
    # xpad_ref : (H+2, W*C)     bf16 VMEM scratch (vertically zero-padded input)
    # mid_ref  : (H+2, W*C)     bf16 VMEM scratch (vertically zero-padded intermediate)
    H = o_ref.shape[1]
    WC = o_ref.shape[2]

    zrow = jnp.zeros((1, WC), xpad_ref.dtype)
    x2d = x_ref[0]                                   # (H, W*C) bf16 — single HBM read

    # Vertical zero-padding only (horizontal padding is folded into the banded weights):
    # 3 contiguous full-width stores, no 1-lane column strips.
    xpad_ref[0:1, :] = zrow
    xpad_ref[H + 1:H + 2, :] = zrow
    xpad_ref[1:H + 1, :] = x2d

    # ---- conv_1: 3 matmuls (one per ky), K = N = W*C, f32 accumulation ----
    acc = jnp.zeros((H, WC), jnp.float32)
    for ky in range(3):
        acc = acc + jnp.dot(xpad_ref[ky:ky + H, :], w1_ref[ky],
                            preferred_element_type=jnp.float32)

    # ---- bn_1 + relu (f32 elementwise) ----
    y1 = jnp.maximum(acc * s1_ref[...] + b1_ref[...], 0.0)          # (H, W*C) f32

    mid_ref[0:1, :] = zrow
    mid_ref[H + 1:H + 2, :] = zrow
    mid_ref[1:H + 1, :] = y1.astype(mid_ref.dtype)

    # ---- conv_2 ----
    acc2 = jnp.zeros((H, WC), jnp.float32)
    for ky in range(3):
        acc2 = acc2 + jnp.dot(mid_ref[ky:ky + H, :], w2_ref[ky],
                              preferred_element_type=jnp.float32)

    # ---- bn_2 + residual add + relu; single lane-dense bf16 store ----
    # Residual reuses the already-loaded bf16 tile (intentional inference-mode rounding).
    y2 = acc2 * s2_ref[...] + b2_ref[...] + x2d.astype(jnp.float32)
    o_ref[0] = jnp.maximum(y2, 0.0).astype(o_ref.dtype)


def _banded_weights(w_oihw, W):
    """Fold the 3 horizontal taps, the channels and the horizontal zero-padding of a
    3x3 conv into 3 banded matrices of shape (W*Cin, W*Cout), one per vertical tap."""
    Cout, Cin, _, _ = w_oihw.shape
    w_hwio = jnp.transpose(w_oihw, (2, 3, 1, 0)).astype(jnp.float32)    # (ky, kx, ci, co)
    wcol = jnp.arange(W)[None, :, None]          # input column (unpadded)
    wout = jnp.arange(W)[None, None, :]          # output column
    kx = jnp.arange(3)[:, None, None]
    ind = (wcol == wout + kx - 1).astype(jnp.float32)                   # (3, W, W) band mask
    b = jnp.einsum('kxio,xcw->kciwo', w_hwio, ind)                      # (3, W, Cin, W, Cout)
    return b.reshape(3, W * Cin, W * Cout).astype(jnp.bfloat16)


def resnet_basic_block(x_nchw, w1, g1, be1, m1, v1, w2, g2, be2, m2, v2, eps=1e-5):
    """ResnetBasicBlock forward. x_nchw: (N, C, H, W) f32; conv weights OIHW (Cout, Cin, 3, 3)."""
    N, C, H, W = x_nchw.shape
    Cout = w1.shape[0]
    assert Cout == C, "identity shortcut requires in_channels == out_channels"
    WC = W * Cout

    # TODO(synk): these per-call layout/weight preparations disappear in an end-to-end model.
    x = jnp.transpose(x_nchw, (0, 2, 3, 1)).reshape(N, H, W * C).astype(jnp.bfloat16)
    w1b = _banded_weights(w1, W)
    w2b = _banded_weights(w2, W)

    inv1 = 1.0 / jnp.sqrt(v1 + eps)
    inv2 = 1.0 / jnp.sqrt(v2 + eps)
    s1c = (g1 * inv1).astype(jnp.float32)
    b1c = (be1 - m1 * g1 * inv1).astype(jnp.float32)
    s2c = (g2 * inv2).astype(jnp.float32)
    b2c = (be2 - m2 * g2 * inv2).astype(jnp.float32)
    s1 = jnp.tile(s1c, W).reshape(1, WC)
    b1 = jnp.tile(b1c, W).reshape(1, WC)
    s2 = jnp.tile(s2c, W).reshape(1, WC)
    b2 = jnp.tile(b2c, W).reshape(1, WC)

    flops = N * 2 * 3 * 2 * H * WC * WC                 # 6 matmuls per batch element
    bytes_accessed = (N * H * WC * 2                    # x, bf16, read once
                      + 2 * 3 * WC * WC * 2             # banded conv weights, bf16
                      + 4 * WC * 4                      # folded BN scale/bias, f32
                      + N * H * WC * 2)                 # output, bf16

    out = pl.pallas_call(
        resnet_block_kernel,
        out_shape=jax.ShapeDtypeStruct((N, H, WC), jnp.bfloat16),
        grid_spec=pltpu.PrefetchScalarGridSpec(
            num_scalar_prefetch=0,
            grid=(N,),
            in_specs=[
                pl.BlockSpec((1, H, WC), lambda n: (n, 0, 0)),
                pl.BlockSpec((3, WC, WC), lambda n: (0, 0, 0)),
                pl.BlockSpec((1, WC), lambda n: (0, 0)),
                pl.BlockSpec((1, WC), lambda n: (0, 0)),
                pl.BlockSpec((3, WC, WC), lambda n: (0, 0, 0)),
                pl.BlockSpec((1, WC), lambda n: (0, 0)),
                pl.BlockSpec((1, WC), lambda n: (0, 0)),
            ],
            out_specs=pl.BlockSpec((1, H, WC), lambda n: (n, 0, 0)),
            scratch_shapes=[
                pltpu.VMEM((H + 2, WC), jnp.bfloat16),
                pltpu.VMEM((H + 2, WC), jnp.bfloat16),
            ],
        ),
        compiler_params=pltpu.CompilerParams(dimension_semantics=("parallel",)),
        cost_estimate=pl.CostEstimate(flops=flops, transcendentals=0,
                                      bytes_accessed=bytes_accessed),
    )(x, w1b, s1, b1, w2b, s2, b2)

    # Back to NCHW f32 for comparison with the reference (a bf16 NHWC consumer would
    # skip both the transpose and the cast).
    out = out.reshape(N, H, W, Cout)
    return jnp.transpose(out, (0, 3, 1, 2)).astype(jnp.float32)


def reference(x, w1, g1, be1, m1, v1, w2, g2, be2, m2, v2, eps=1e-5):
    """Pure-JAX f32 reference of the PyTorch forward (eval-mode BN)."""
    def conv(a, w):
        return jax.lax.conv_general_dilated(
            a, w, window_strides=(1, 1), padding=((1, 1), (1, 1)),
            dimension_numbers=('NCHW', 'OIHW', 'NCHW'))

    def bn(a, g, b, m, v):
        g, b, m, v = (t[None, :, None, None] for t in (g, b, m, v))
        return (a - m) / jnp.sqrt(v + eps) * g + b

    out = jax.nn.relu(bn(conv(x, w1), g1, be1, m1, v1))
    out = bn(conv(out, w2), g2, be2, m2, v2)
    return jax.nn.relu(out + x)


if __name__ == "__main__":
    key = jax.random.PRNGKey(0)
    ks = jax.random.split(key, 11)

    N, C, H, W = 2, 4, 16, 16
    x = jax.random.normal(ks[0], (N, C, H, W), jnp.float32)

    fan_in = C * 3 * 3
    w1 = jax.random.normal(ks[1], (C, C, 3, 3), jnp.float32) * (2.0 / fan_in) ** 0.5
    w2 = jax.random.normal(ks[2], (C, C, 3, 3), jnp.float32) * (2.0 / fan_in) ** 0.5

    g1 = 1.0 + 0.1 * jax.random.normal(ks[3], (C,), jnp.float32)
    be1 = 0.1 * jax.random.normal(ks[4], (C,), jnp.float32)
    m1 = 0.1 * jax.random.normal(ks[5], (C,), jnp.float32)
    v1 = jnp.abs(jax.random.normal(ks[6], (C,), jnp.float32)) + 0.5

    g2 = 1.0 + 0.1 * jax.random.normal(ks[7], (C,), jnp.float32)
    be2 = 0.1 * jax.random.normal(ks[8], (C,), jnp.float32)
    m2 = 0.1 * jax.random.normal(ks[9], (C,), jnp.float32)
    v2 = jnp.abs(jax.random.normal(ks[10], (C,), jnp.float32)) + 0.5

    params = (w1, g1, be1, m1, v1, w2, g2, be2, m2, v2)

    out = resnet_basic_block(x, *params)
    out = jax.block_until_ready(out)

    ref = reference(x, *params)
    # Tolerances account for bf16 activations/weights/output (f32 accumulation on the MXU).
    np.testing.assert_allclose(np.asarray(out), np.asarray(ref),
                               atol=1e-1, rtol=5e-2)
    print("KERNEL_OK")
</pallas_src>

<mosaic_0001>
module attributes {stable_mosaic.version = 11 : i64} {
  func.func @resnet_block_kernel(%arg0: i32, %arg1: memref<1x16x64xbf16, #tpu.memory_space<vmem>>, %arg2: memref<3x64x64xbf16, #tpu.memory_space<vmem>>, %arg3: memref<1x64xf32, #tpu.memory_space<vmem>>, %arg4: memref<1x64xf32, #tpu.memory_space<vmem>>, %arg5: memref<3x64x64xbf16, #tpu.memory_space<vmem>>, %arg6: memref<1x64xf32, #tpu.memory_space<vmem>>, %arg7: memref<1x64xf32, #tpu.memory_space<vmem>>, %arg8: memref<1x16x64xbf16, #tpu.memory_space<vmem>>, %arg9: memref<18x64xbf16, #tpu.memory_space<vmem>>, %arg10: memref<18x64xbf16, #tpu.memory_space<vmem>>) attributes {dimension_semantics = [#tpu.dimension_semantics<parallel>], iteration_bounds = array<i64: 2>, scalar_prefetch = 0 : i64, scratch_operands = 2 : i64, tpu.core_type = #tpu.core_type<tc>, window_params = [{transform_indices = @transform_0, window_bounds = array<i64: 1, 16, 64>}, {pipeline_mode = #tpu.pipeline_mode<synchronous>, transform_indices = @transform_1, window_bounds = array<i64: 3, 64, 64>}, {pipeline_mode = #tpu.pipeline_mode<synchronous>, transform_indices = @transform_2, window_bounds = array<i64: 1, 64>}, {pipeline_mode = #tpu.pipeline_mode<synchronous>, transform_indices = @transform_3, window_bounds = array<i64: 1, 64>}, {pipeline_mode = #tpu.pipeline_mode<synchronous>, transform_indices = @transform_4, window_bounds = array<i64: 3, 64, 64>}, {pipeline_mode = #tpu.pipeline_mode<synchronous>, transform_indices = @transform_5, window_bounds = array<i64: 1, 64>}, {pipeline_mode = #tpu.pipeline_mode<synchronous>, transform_indices = @transform_6, window_bounds = array<i64: 1, 64>}, {transform_indices = @transform_7, window_bounds = array<i64: 1, 16, 64>}]} {
    %cst = arith.constant 0.000000e+00 : bf16
    %0 = vector.broadcast %cst : bf16 to vector<1x64xbf16>
    %c0 = arith.constant 0 : index
    %c0_0 = arith.constant 0 : index
    %c0_1 = arith.constant 0 : index
    %1 = vector.load %arg1[%c0, %c0_0, %c0_1] : memref<1x16x64xbf16, #tpu.memory_space<vmem>>, vector<1x16x64xbf16>
    %2 = vector.shape_cast %1 : vector<1x16x64xbf16> to vector<16x64xbf16>
    %c0_2 = arith.constant 0 : index
    %c0_3 = arith.constant 0 : index
    %3 = vector.load %arg9[%c0_2, %c0_3] : memref<18x64xbf16, #tpu.memory_space<vmem>>, vector<1x64xbf16>
    tpu.vector_store %arg9[%c0_2, %c0_3], %0 {strides = array<i32>} : memref<18x64xbf16, #tpu.memory_space<vmem>>, vector<1x64xbf16>,
    %c17 = arith.constant 17 : index
    %c0_4 = arith.constant 0 : index
    %4 = vector.load %arg9[%c17, %c0_4] : memref<18x64xbf16, #tpu.memory_space<vmem>>, vector<1x64xbf16>
    tpu.vector_store %arg9[%c17, %c0_4], %0 {strides = array<i32>} : memref<18x64xbf16, #tpu.memory_space<vmem>>, vector<1x64xbf16>,
    %c1 = arith.constant 1 : index
    %c0_5 = arith.constant 0 : index
    %5 = vector.load %arg9[%c1, %c0_5] : memref<18x64xbf16, #tpu.memory_space<vmem>>, vector<16x64xbf16>
    tpu.vector_store %arg9[%c1, %c0_5], %2 {strides = array<i32>} : memref<18x64xbf16, #tpu.memory_space<vmem>>, vector<16x64xbf16>,
    %cst_6 = arith.constant 0.000000e+00 : f32
    %6 = vector.broadcast %cst_6 : f32 to vector<16x64xf32>
    %c0_7 = arith.constant 0 : index
    %c0_8 = arith.constant 0 : index
    %7 = vector.load %arg9[%c0_7, %c0_8] : memref<18x64xbf16, #tpu.memory_space<vmem>>, vector<16x64xbf16>
    %c0_9 = arith.constant 0 : index
    %c0_10 = arith.constant 0 : index
    %c0_11 = arith.constant 0 : index
    %8 = vector.load %arg2[%c0_9, %c0_10, %c0_11] : memref<3x64x64xbf16, #tpu.memory_space<vmem>>, vector<1x64x64xbf16>
    %9 = vector.shape_cast %8 : vector<1x64x64xbf16> to vector<64x64xbf16>
    %cst_12 = arith.constant dense<0.000000e+00> : vector<16x64xf32>
    %10 = tpu.matmul %7, %9, %cst_12 {dimension_numbers = #tpu.dot_dimension_numbers<[1], [0], [0], [1], [0, 0, 1, 1], [], []>} : vector<16x64xbf16>, vector<64x64xbf16>, vector<16x64xf32> -> vector<16x64xf32>
    %11 = arith.addf %6, %10 : vector<16x64xf32>
    %c1_13 = arith.constant 1 : index
    %c0_14 = arith.constant 0 : index
    %12 = vector.load %arg9[%c1_13, %c0_14] : memref<18x64xbf16, #tpu.memory_space<vmem>>, vector<16x64xbf16>
    %c1_15 = arith.constant 1 : index
    %c0_16 = arith.constant 0 : index
    %c0_17 = arith.constant 0 : index
    %13 = vector.load %arg2[%c1_15, %c0_16, %c0_17] : memref<3x64x64xbf16, #tpu.memory_space<vmem>>, vector<1x64x64xbf16>
    %14 = vector.shape_cast %13 : vector<1x64x64xbf16> to vector<64x64xbf16>
    %cst_18 = arith.constant dense<0.000000e+00> : vector<16x64xf32>
    %15 = tpu.matmul %12, %14, %cst_18 {dimension_numbers = #tpu.dot_dimension_numbers<[1], [0], [0], [1], [0, 0, 1, 1], [], []>} : vector<16x64xbf16>, vector<64x64xbf16>, vector<16x64xf32> -> vector<16x64xf32>
    %16 = arith.addf %11, %15 : vector<16x64xf32>
    %c2 = arith.constant 2 : index
    %c0_19 = arith.constant 0 : index
    %17 = vector.load %arg9[%c2, %c0_19] : memref<18x64xbf16, #tpu.memory_space<vmem>>, vector<16x64xbf16>
    %c2_20 = arith.constant 2 : index
    %c0_21 = arith.constant 0 : index
    %c0_22 = arith.constant 0 : index
    %18 = vector.load %arg2[%c2_20, %c0_21, %c0_22] : memref<3x64x64xbf16, #tpu.memory_space<vmem>>, vector<1x64x64xbf16>
    %19 = vector.shape_cast %18 : vector<1x64x64xbf16> to vector<64x64xbf16>
    %cst_23 = arith.constant dense<0.000000e+00> : vector<16x64xf32>
    %20 = tpu.matmul %17, %19, %cst_23 {dimension_numbers = #tpu.dot_dimension_numbers<[1], [0], [0], [1], [0, 0, 1, 1], [], []>} : vector<16x64xbf16>, vector<64x64xbf16>, vector<16x64xf32> -> vector<16x64xf32>
    %21 = arith.addf %16, %20 : vector<16x64xf32>
    %c0_24 = arith.constant 0 : index
    %c0_25 = arith.constant 0 : index
    %22 = vector.load %arg3[%c0_24, %c0_25] : memref<1x64xf32, #tpu.memory_space<vmem>>, vector<1x64xf32>
    %23 = vector.broadcast %22 : vector<1x64xf32> to vector<16x64xf32>
    %24 = arith.mulf %21, %23 : vector<16x64xf32>
    %c0_26 = arith.constant 0 : index
    %c0_27 = arith.constant 0 : index
    %25 = vector.load %arg4[%c0_26, %c0_27] : memref<1x64xf32, #tpu.memory_space<vmem>>, vector<1x64xf32>
    %26 = vector.broadcast %25 : vector<1x64xf32> to vector<16x64xf32>
    %27 = arith.addf %24, %26 : vector<16x64xf32>
    %cst_28 = arith.constant 0.000000e+00 : f32
    %28 = vector.broadcast %cst_28 : f32 to vector<16x64xf32>
    %29 = arith.maximumf %27, %28 : vector<16x64xf32>
    %c0_29 = arith.constant 0 : index
    %c0_30 = arith.constant 0 : index
    %30 = vector.load %arg10[%c0_29, %c0_30] : memref<18x64xbf16, #tpu.memory_space<vmem>>, vector<1x64xbf16>
    tpu.vector_store %arg10[%c0_29, %c0_30], %0 {strides = array<i32>} : memref<18x64xbf16, #tpu.memory_space<vmem>>, vector<1x64xbf16>,
    %c17_31 = arith.constant 17 : index
    %c0_32 = arith.constant 0 : index
    %31 = vector.load %arg10[%c17_31, %c0_32] : memref<18x64xbf16, #tpu.memory_space<vmem>>, vector<1x64xbf16>
    tpu.vector_store %arg10[%c17_31, %c0_32], %0 {strides = array<i32>} : memref<18x64xbf16, #tpu.memory_space<vmem>>, vector<1x64xbf16>,
    %32 = arith.truncf %29 : vector<16x64xf32> to vector<16x64xbf16>
    %c1_33 = arith.constant 1 : index
    %c0_34 = arith.constant 0 : index
    %33 = vector.load %arg10[%c1_33, %c0_34] : memref<18x64xbf16, #tpu.memory_space<vmem>>, vector<16x64xbf16>
    tpu.vector_store %arg10[%c1_33, %c0_34], %32 {strides = array<i32>} : memref<18x64xbf16, #tpu.memory_space<vmem>>, vector<16x64xbf16>,
    %cst_35 = arith.constant 0.000000e+00 : f32
    %34 = vector.broadcast %cst_35 : f32 to vector<16x64xf32>
    %c0_36 = arith.constant 0 : index
    %c0_37 = arith.constant 0 : index
    %35 = vector.load %arg10[%c0_36, %c0_37] : memref<18x64xbf16, #tpu.memory_space<vmem>>, vector<16x64xbf16>
    %c0_38 = arith.constant 0 : index
    %c0_39 = arith.constant 0 : index
    %c0_40 = arith.constant 0 : index
    %36 = vector.load %arg5[%c0_38, %c0_39, %c0_40] : memref<3x64x64xbf16, #tpu.memory_space<vmem>>, vector<1x64x64xbf16>
    %37 = vector.shape_cast %36 : vector<1x64x64xbf16> to vector<64x64xbf16>
    %cst_41 = arith.constant dense<0.000000e+00> : vector<16x64xf32>
    %38 = tpu.matmul %35, %37, %cst_41 {dimension_numbers = #tpu.dot_dimension_numbers<[1], [0], [0], [1], [0, 0, 1, 1], [], []>} : vector<16x64xbf16>, vector<64x64xbf16>, vector<16x64xf32> -> vector<16x64xf32>
    %39 = arith.addf %34, %38 : vector<16x64xf32>
    %c1_42 = arith.constant 1 : index
    %c0_43 = arith.constant 0 : index
    %40 = vector.load %arg10[%c1_42, %c0_43] : memref<18x64xbf16, #tpu.memory_space<vmem>>, vector<16x64xbf16>
    %c1_44 = arith.constant 1 : index
    %c0_45 = arith.constant 0 : index
    %c0_46 = arith.constant 0 : index
    %41 = vector.load %arg5[%c1_44, %c0_45, %c0_46] : memref<3x64x64xbf16, #tpu.memory_space<vmem>>, vector<1x64x64xbf16>
    %42 = vector.shape_cast %41 : vector<1x64x64xbf16> to vector<64x64xbf16>
    %cst_47 = arith.constant dense<0.000000e+00> : vector<16x64xf32>
    %43 = tpu.matmul %40, %42, %cst_47 {dimension_numbers = #tpu.dot_dimension_numbers<[1], [0], [0], [1], [0, 0, 1, 1], [], []>} : vector<16x64xbf16>, vector<64x64xbf16>, vector<16x64xf32> -> vector<16x64xf32>
    %44 = arith.addf %39, %43 : vector<16x64xf32>
    %c2_48 = arith.constant 2 : index
    %c0_49 = arith.constant 0 : index
    %45 = vector.load %arg10[%c2_48, %c0_49] : memref<18x64xbf16, #tpu.memory_space<vmem>>, vector<16x64xbf16>
    %c2_50 = arith.constant 2 : index
    %c0_51 = arith.constant 0 : index
    %c0_52 = arith.constant 0 : index
    %46 = vector.load %arg5[%c2_50, %c0_51, %c0_52] : memref<3x64x64xbf16, #tpu.memory_space<vmem>>, vector<1x64x64xbf16>
    %47 = vector.shape_cast %46 : vector<1x64x64xbf16> to vector<64x64xbf16>
    %cst_53 = arith.constant dense<0.000000e+00> : vector<16x64xf32>
    %48 = tpu.matmul %45, %47, %cst_53 {dimension_numbers = #tpu.dot_dimension_numbers<[1], [0], [0], [1], [0, 0, 1, 1], [], []>} : vector<16x64xbf16>, vector<64x64xbf16>, vector<16x64xf32> -> vector<16x64xf32>
    %49 = arith.addf %44, %48 : vector<16x64xf32>
    %c0_54 = arith.constant 0 : index
    %c0_55 = arith.constant 0 : index
    %50 = vector.load %arg6[%c0_54, %c0_55] : memref<1x64xf32, #tpu.memory_space<vmem>>, vector<1x64xf32>
    %51 = vector.broadcast %50 : vector<1x64xf32> to vector<16x64xf32>
    %52 = arith.mulf %49, %51 : vector<16x64xf32>
    %c0_56 = arith.constant 0 : index
    %c0_57 = arith.constant 0 : index
    %53 = vector.load %arg7[%c0_56, %c0_57] : memref<1x64xf32, #tpu.memory_space<vmem>>, vector<1x64xf32>
    %54 = vector.broadcast %53 : vector<1x64xf32> to vector<16x64xf32>
    %55 = arith.addf %52, %54 : vector<16x64xf32>
    %56 = arith.extf %2 : vector<16x64xbf16> to vector<16x64xf32>
    %57 = arith.addf %55, %56 : vector<16x64xf32>
    %cst_58 = arith.constant 0.000000e+00 : f32
    %58 = vector.broadcast %cst_58 : f32 to vector<16x64xf32>
    %59 = arith.maximumf %57, %58 : vector<16x64xf32>
    %60 = arith.truncf %59 : vector<16x64xf32> to vector<16x64xbf16>
    %c0_59 = arith.constant 0 : index
    %c0_60 = arith.constant 0 : index
    %c0_61 = arith.constant 0 : index
    %61 = vector.load %arg8[%c0_59, %c0_60, %c0_61] : memref<1x16x64xbf16, #tpu.memory_space<vmem>>, vector<1x16x64xbf16>
    %62 = vector.shape_cast %61 : vector<1x16x64xbf16> to vector<16x64xbf16>
    %63 = vector.shape_cast %60 : vector<16x64xbf16> to vector<1x16x64xbf16>
    tpu.vector_store %arg8[%c0_59, %c0_60, %c0_61], %63 {strides = array<i32>} : memref<1x16x64xbf16, #tpu.memory_space<vmem>>, vector<1x16x64xbf16>,
    return
  }
  func.func @transform_0(%arg0: i32) -> (i32, i32, i32) {
    %c0_i32 = arith.constant 0 : i32
    %c0_i32_0 = arith.constant 0 : i32
    %c0_i32_1 = arith.constant 0 : i32
    return %arg0, %c0_i32, %c0_i32_0 : i32, i32, i32
  }
  func.func @transform_1(%arg0: i32) -> (i32, i32, i32) {
    %c0_i32 = arith.constant 0 : i32
    %c0_i32_0 = arith.constant 0 : i32
    %c0_i32_1 = arith.constant 0 : i32
    %c0_i32_2 = arith.constant 0 : i32
    return %c0_i32, %c0_i32_0, %c0_i32_1 : i32, i32, i32
  }
  func.func @transform_2(%arg0: i32) -> (i32, i32) {
    %c0_i32 = arith.constant 0 : i32
    %c0_i32_0 = arith.constant 0 : i32
    %c0_i32_1 = arith.constant 0 : i32
    return %c0_i32, %c0_i32_0 : i32, i32
  }
  func.func @transform_3(%arg0: i32) -> (i32, i32) {
    %c0_i32 = arith.constant 0 : i32
    %c0_i32_0 = arith.constant 0 : i32
    %c0_i32_1 = arith.constant 0 : i32
    return %c0_i32, %c0_i32_0 : i32, i32
  }
  func.func @transform_4(%arg0: i32) -> (i32, i32, i32) {
    %c0_i32 = arith.constant 0 : i32
    %c0_i32_0 = arith.constant 0 : i32
    %c0_i32_1 = arith.constant 0 : i32
    %c0_i32_2 = arith.constant 0 : i32
    return %c0_i32, %c0_i32_0, %c0_i32_1 : i32, i32, i32
  }
  func.func @transform_5(%arg0: i32) -> (i32, i32) {
    %c0_i32 = arith.constant 0 : i32
    %c0_i32_0 = arith.constant 0 : i32
    %c0_i32_1 = arith.constant 0 : i32
    return %c0_i32, %c0_i32_0 : i32, i32
  }
  func.func @transform_6(%arg0: i32) -> (i32, i32) {
    %c0_i32 = arith.constant 0 : i32
    %c0_i32_0 = arith.constant 0 : i32
    %c0_i32_1 = arith.constant 0 : i32
    return %c0_i32, %c0_i32_0 : i32, i32
  }
  func.func @transform_7(%arg0: i32) -> (i32, i32, i32) {
    %c0_i32 = arith.constant 0 : i32
    %c0_i32_0 = arith.constant 0 : i32
    %c0_i32_1 = arith.constant 0 : i32
    return %arg0, %c0_i32, %c0_i32_0 : i32, i32, i32
  }
}

</mosaic_0001>

<bundles_post_ra>
// kernel: tpu_custom_call.1
= control target key start
LH: loop header
LB: loop body
LE: loop exit
PB: predicated region body
PF: predicated region fallthrough
CT: control target
= control target key end

     0   :  { %s1595_s0 = inlined_call_operand.hbm [shape: bf16[2,16,64], index: 0, kind: input, shape index: {}]   ;;  %s1596_s1 = inlined_call_operand.hbm [shape: bf16[3,64,64], index: 1, kind: input, shape index: {}]   ;;  %s1597_s2 = inlined_call_operand.vmem [shape: f32[1,64], index: 2, kind: input, shape index: {}]   ;;  %s1598_s3 = inlined_call_operand.vmem [shape: f32[1,64], index: 3, kind: input, shape index: {}]   ;;  %s1599_s4 = inlined_call_operand.hbm [shape: bf16[3,64,64], index: 4, kind: input, shape index: {}]   ;;  %s1600_s5 = inlined_call_operand.vmem [shape: f32[1,64], index: 5, kind: input, shape index: {}]   ;;  %s1601_s6 = inlined_call_operand.vmem [shape: f32[1,64], index: 6, kind: input, shape index: {}]   ;;  %s1602_s7 = inlined_call_operand.hbm [shape: bf16[2,16,64], index: 7, kind: output, shape index: {}]  }
   0x1   :  { %1605 = sst [smem:[#allocation14_spill]] %s1596_s1 }
   0x2   :  { %12 = vsyncpa [#allocation5], 0 }
   0x3   :  { %14 = vsyncpa [#allocation5 + $0x1], 0 }
   0x4   :  { %15 = vsyncpa [#allocation8], 0 }
   0x5   :  { %16 = vsyncpa [#allocation6], 0 }
   0x6   :  { %18 = vsyncpa [#allocation6 + $0x1], 0  ;;  %s1363_s24 = smov 0   ;;  %s1365_s25 = smov 0  }
   0x7   :  { %s1367_s26 = smov 0   ;;  %s1369_s27 = smov 0  }
   0x8 LB: > { %s1384_s28 = sadd.s32 4294967295, %s1315_s27   ;;  %s920_s29 = sadd.s32 4294967294, %s1315_s27   ;;  %s1315_s27 = sphi %s1369_s27, %s1626_s27   ;;  %s1311_s26 = sphi %s1367_s26, %s1625_s26   ;;  %s1307_s25 = sphi %s1365_s25, %s1624_s25   ;;  %s1303_s24 = sphi %s1363_s24, %s1623_s24  }
   0x9   : > { %p44_p0 = scmp.ne.s32.totalorder %s1307_s25, %s1303_s24  ;;  %p45_p1 = scmp.eq.s32.totalorder %s1384_s28, 0 }
   0xa   : > { %p194_p2 = scmp.eq.s32.totalorder %s1384_s28, 1  ;;  %p200_p3 = scmp.eq.s32.totalorder %s920_s29, 1 }
   0xb   : > { %p1393_p4 = por %p45_p1, %p44_p0  ;;  %p921_p5 = scmp.ge.s32.totalorder %s1315_s27, 1 }
   0xc   : > { %p1398_p6 = por %p200_p3, %p44_p0  ;;  %p207_p7 = scmp.lt.s32.totalorder %s1315_s27, 3 }
   0xd   : > { %s1608_s1 = sld [smem:[#allocation14_spill]]  ;;  %s1317_s13 = smov [#allocation7]  }
   0xe   : > { %p1406_p8 = pnand %p921_p5, %p207_p7  ;;  %s220_s14 = sshll.u32 %s1317_s13, 4  ;;  %s221_s14 = int_to_ptr.vmem [resolvable:$true] %s220_s14 }
   0xf   : > { %s238_s17 = sshll.u32 %s1599_s4, 4  ;;  %s1603_s18 = smov 64   ;;  %s239_s17 = int_to_ptr.hbm [resolvable:$true] %s238_s17 }
  0x10   : > { %p1092_p9 = pneg %p1406_p8  ;;  %s1604_s19 = smov 4  }
  0x11   : > { %s1320_s20 = smov [#allocation9]   ;;  %s1425_s22 = sadd.s32 1, %s1315_s27  }
  0x12   : > { %p1093_p10 = pnand %p1092_p9, %p45_p1  ;;  %s240_s21 = sshll.u32 %s1320_s20, 4  ;;  %s241_s21 = int_to_ptr.vmem [resolvable:$true] %s240_s21 }
  0x13   : > { %s218_s11 = sshll.u32 %s1608_s1, 4  ;;  %s31_s23 = sadd.s32 1, %s1311_s26  ;;  %s219_s11 = int_to_ptr.hbm [resolvable:$true] %s218_s11 }
  0x14   : > { %1095 = dma.hbm_to_vmem [thread:$0]  (!%p1093_p10), %s219_s11, 1536, %s221_s14, [#allocation8], %s1603_s18, %s1603_s18, %s1604_s19  }
  0x15   : > { %1098 = dma.hbm_to_vmem [thread:$0]  (!%p1093_p10), %s239_s17, 1536, %s241_s21, [#allocation8], %s1603_s18, %s1603_s18, %s1604_s19  }
  0x16   : > { %s28_s29 = ssub.s32 %s1315_s27, %s1425_s22  ;;  %p38_p12 = scmp.ne.s32.totalorder %s1311_s26, %s1307_s25 }
  0x17   : > { %p29_p13 = scmp.eq.s32.totalorder %s28_s29, 0  ;;  %p39_p0 = scmp.eq.s32.totalorder %s1315_s27, 0 }
  0x18   : > { %p1435_p3 = por %p194_p2, %p38_p12  ;;  %p1109_p5 = scmp.lt.s32.totalorder %s1315_s27, 2 }
  0x19   : > { %s1441_s10 = scalar_select %p29_p13, %s1311_s26, %s31_s23  }
  0x1a   : > { %p40_p7 = por %p39_p0, %p38_p12  ;;  %s260_s11 = sand.u32 1, %s1311_s26  }
  0x1b   : > { %s925_s13 = sshll.u32 %s260_s11, 3  ;;  %s1040_s14 = sshll.u32 %s1315_s27, 3 }
  0x1c   : > { %s269_s17 = scalar_lea.hbm %s1595_s0, %s1040_s14  ;;  %s264_s20 = scalar_lea.vmem [#allocation4], %s925_s13 }
  0x1d   : > { %s272_s21 = sshll.u32 %s264_s20, 4  ;;  %s270_s29 = sshll.u32 %s269_s17, 4  ;;  %s273_s21 = int_to_ptr.vmem [resolvable:$true] %s272_s21  ;;  %s271_s29 = int_to_ptr.hbm [resolvable:$true] %s270_s29 }
  0x1e   : > { %p1448_p2 = pnand %p1109_p5, %p40_p7  ;;  %s261_s23 = scalar_lea.sflag [#allocation5], %s260_s11 }
  0x1f   : > { %s1215_s19 = sshra.s32 %s271_s29, 4  ;;  %s1222_s15 = scalar_lea.hbm %s1595_s0, 16  ;;  %s1216_s19 = int_to_ptr.hbm [resolvable:$true] %s1215_s19 }
  0x20   : > { %s1217_s1 = scalar_lea.hbm %s1216_s19, 8  ;;  %p1219_p10 = pneg %p1448_p2 }
  0x21   : > { %p1218_p9 = scmp.ne.s32.totalorder %s1216_s19, %s1217_s1  ;;  %p1223_p0 = scmp.lt.s32.totalorder %s1216_s19, %s1595_s0 }
  0x22   : > { %p1224_p5 = scmp.lt.s32.totalorder %s1222_s15, %s1217_s1 }
  0x23   : > { %p1220_p12 = pnand %p1219_p10, %p1218_p9 }
  0x24   : > { %p1225_p7 = por %p1224_p5, %p1223_p0 }
  0x25   : > { %p1221_p13 = pneg %p1220_p12 }
  0x27   : > { %p1226_p11 = pnand %p1225_p7, %p1221_p13 }
  0x29   : > { %1229 = shalt.err (!%p1226_p11)
}
  0x2a   : > { %s1612_s11 = smov 4   ;;  %s1613_s20 = smov 64  }
  0x2b   : > { %1102 = dma.hbm_to_vmem [thread:$0]  (!%p1448_p2), %s271_s29, 128, %s273_s21, %s261_s23, %s1613_s20, %s1613_s20, %s1612_s11  }
  0x2c   : > { %284 = sbr.rel (%p1406_p8) target bundleno = 416 (0x1a0), region = 48  ;;  %s1468_s14 = sand.u32 (!%p1406_p8), 1, %s1307_s25  }
  0x2d   : > { %s929_s1 = sshll.u32 (!%p1406_p8), %s1468_s14, 3  ;;  %s287_s19 = scalar_lea.sflag (!%p1406_p8), [#allocation5], %s1468_s14 }
  0x2e   : > { %s290_s13 = scalar_lea.vmem (!%p1406_p8), [#allocation4], %s929_s1 }
  0x31   : > { %1290 = dma.done.wait (%p1393_p4), %s287_s19, 128  }
  0x32   : > { %1292 = vsyncadd (%p1393_p4), %s287_s19, 4294967168 }
  0x33   : > { %1294 = dma.done.wait (%p45_p1), [#allocation8], 3072  }
  0x34   : > { %1296 = vsyncadd (%p45_p1), [#allocation8], 4294964224  ;;  %vm336_vm0 = vsmask.f32 256  ;;  %vm335_vm1 = vcmask 516096   ;;  %v1044_v0 = vld [vmem:[#allocation7 + $0x18] sm:$0xff] }
  0x35   : > { %vm341_vm2 = vsmask.f32 7938  ;;  %v1052_v1 = vld [vmem:[#allocation7 + $0x58] sm:$0xff]  ;;  %vm1483_vm3 = vmand %vm335_vm1, %vm336_vm0  ;;  %491 = vmatpush.bf16.msra.mxu1 %v1044_v0  ;;  %v1043_v4 = vld [vmem:[#allocation7 + $0x10] sm:$0xff]  ;;  %vm346_vm5 = vsmask.f32 4368 }
  0x36   : > { %v1048_v2 = vld [vmem:[#allocation7 + $0x38] sm:$0xff]  ;;  %549 = vmatpush.bf16.msra.mxu2 %v1052_v1  ;;  %v1051_v5 = vld [vmem:[#allocation7 + $0x50] sm:$0xff]  ;;  %vm1488_vm4 = vmand %vm335_vm1, %vm341_vm2  ;;  %vm368_vm7 = vcmask 519168   ;;  %vm443_vm9 = vcmask 523264   ;;  %vm514_vm10 = vcmask 1046528   ;;  %s1065_s17 = sshll.u32 %s1384_s28, 3 }
  0x37   : > { %451 = vmatpush.bf16.msra.mxu0 %v1048_v2  ;;  %v1047_v7 = vld [vmem:[#allocation7 + $0x30] sm:$0xff]  ;;  %v338_v10 = vld [vmem:[#allocation2] sm:$0x1]  ;;  %v343_v11 = vld [vmem:[#allocation2 + $0x8] sm:$0x1]  ;;  %s824_s19 = scalar_lea.hbm %s1602_s7, %s1065_s17  ;;  %s813_s28 = scalar_lea.sflag [#allocation6], %s1468_s14 }
  0x38   : > { %v1492_v8 = vld [vmem:[%s290_s13] sm:$0xf]  ;;  %v1494_v9 = vld [vmem:[%s290_s13 + $0x4] sm:$0xf]  ;;  %v1042_v13 = vld [vmem:[#allocation7 + $0x8] sm:$0xff]  ;;  %v339_v15 = vsel %vm1483_vm3, 0, %v338_v10 }
  0x39   : > { %v349_v12 = vshrl.u32 %v1492_v8, 16  ;;  %v1050_v14 = vld [vmem:[#allocation7 + $0x48] sm:$0xff]  ;;  %v344_v16 = vsel %vm1488_vm4, 0, %v343_v11  ;;  %v357_v17 = vshrl.u32 %v1494_v9, 16  ;;  %v360_v18 = vshll.u32 %v1494_v9, 16  ;;  %492 = vmatpush.bf16.msra.mxu1 %v1043_v4  ;;  %vm1506_vm6 = vmor %vm336_vm0, %vm346_vm5  ;;  %v1041_v26 = vld [vmem:[#allocation7] sm:$0xff] }
  0x3a   : > { %550 = vmatpush.bf16.msra.mxu2 %v1051_v5  ;;  %340 = vst [vmem:[#allocation2] sm:$0x1] %v339_v15  ;;  %v352_v20 = vshll.u32 %v1492_v8, 16  ;;  %v1046_v21 = vld [vmem:[#allocation7 + $0x28] sm:$0xff]  ;;  %v1049_v28 = vld [vmem:[#allocation7 + $0x40] sm:$0xff]  ;;  %vm1514_vm8 = vmand %vm368_vm7, %vm341_vm2  ;;  %s331_s13 = scalar_lea.vmem [#allocation10], %s929_s1 }
  0x3b   : > { %v351_v19 = vrot.slane %v349_v12, 7  ;;  %452 = vmatpush.bf16.msra.mxu0 %v1047_v7  ;;  %345 = vst [vmem:[#allocation2 + $0x8] sm:$0x1] %v344_v16  ;;  %v359_v22 = vrot.slane %v357_v17, 7  ;;  %v1045_v32 = vld [vmem:[#allocation7 + $0x20] sm:$0xff]  ;;  %v1056_v58 = vld [vmem:[#allocation9 + $0x18] sm:$0xff] }
  0x3c   : > { %vm406_vm11 = vsmask.f32 7424  ;;  %v575_v54 = vld [vmem:[#allocation3] sm:$0x1]  ;;  %v578_v56 = vld [vmem:[#allocation3 + $0x8] sm:$0x1] }
  0x3d   : > { %v355_v24 = vrot.slane %v351_v19, 4  ;;  %v362_v25 = vor.u32 %v360_v18, %v359_v22  ;;  %493 = vmatpush.bf16.msra.mxu1 %v1042_v13  ;;  %v354_v27 = vor.u32 %v352_v20, %v351_v19  ;;  %v364_v30 = vrot.slane %v359_v22, 4  ;;  %v1055_v59 = vld [vmem:[#allocation9 + $0x10] sm:$0xff]  ;;  %v1064_v60 = vld [vmem:[#allocation9 + $0x58] sm:$0xff]  ;;  %v1054_v61 = vld [vmem:[#allocation9 + $0x8] sm:$0xff]  ;;  %s825_s30 = sshll.u32 %s331_s13, 4  ;;  %s826_s30 = int_to_ptr.vmem [resolvable:$true] %s825_s30 }
  0x3e   : > { %551 = vmatpush.bf16.msra.mxu2 %v1050_v14  ;;  %v576_v55 = vsel %vm1483_vm3, 0, %v575_v54  ;;  %v579_v57 = vsel %vm1488_vm4, 0, %v578_v56  ;;  %v1060_v62 = vld [vmem:[#allocation9 + $0x38] sm:$0xff]  ;;  %v1063_v63 = vld [vmem:[#allocation9 + $0x50] sm:$0xff]  ;;  %v1053_v2 = vld [vmem:[#allocation9] sm:$0xff]  ;;  %s827_s12 = sshll.u32 %s824_s19, 4  ;;  %s828_s12 = int_to_ptr.hbm [resolvable:$true] %s827_s12 }
  0x3f   : > { %453 = vmatpush.bf16.msra.mxu0 %v1046_v21  ;;  %v363_v29 = vsel %vm1506_vm6, %v355_v24, %v362_v25  ;;  %577 = vst [vmem:[#allocation3] sm:$0x1] %v576_v55  ;;  %681 = vmatpush.bf16.msra.mxu3 %v1060_v62  ;;  %v1059_v5 = vld [vmem:[#allocation9 + $0x30] sm:$0xff]  ;;  %v1151_v6 = vld [vmem:[%s1597_s2] ss:$0 sm:$0xff]  ;;  %v1062_v12 = vld [vmem:[#allocation9 + $0x48] sm:$0xff] }
  0x40   : > { %374 = vst.msk [vmem:[#allocation2 + $0x4] sm:$0xf] %vm368_vm7, %v363_v29  ;;  %v1152_v11 = vld [vmem:[%s1598_s3] ss:$0 sm:$0xff]  ;;  %v1058_v14 = vld [vmem:[#allocation9 + $0x28] sm:$0xff]  ;;  %v1061_v16 = vld [vmem:[#allocation9 + $0x40] sm:$0xff] }
  0x41   : > { %v370_v33 = vld [vmem:[#allocation2] sm:$0xf]  ;;  %494 = vmatpush.bf16.msra.mxu1 %v1041_v26  ;;  %580 = vst [vmem:[#allocation3 + $0x8] sm:$0x1] %v579_v57  ;;  %v1057_v18 = vld [vmem:[#allocation9 + $0x20] sm:$0xff]  ;;  %s1259_s18 = sshra.s32 %s828_s12, 4  ;;  %s1260_s18 = int_to_ptr.hbm [resolvable:$true] %s1259_s18 }
  0x42   : > { %v371_v34 = vsel %vm1514_vm8, %v354_v27, %v370_v33  ;;  %v375_v35 = vld [vmem:[#allocation2 + $0x8] sm:$0x1]  ;;  %552 = vmatpush.bf16.msra.mxu2 %v1049_v28  ;;  %s1261_s21 = scalar_lea.hbm %s1260_s18, 8  ;;  %s1265_s23 = scalar_lea.hbm %s1602_s7, 16 }
  0x43   : > { %372 = vst [vmem:[#allocation2] sm:$0xf] %v371_v34  ;;  %v376_v36 = vsel %vm1483_vm3, %v364_v30, %v375_v35  ;;  %454 = vmatpush.bf16.msra.mxu0 %v1045_v32  ;;  %682 = vmatpush.bf16.msra.mxu3 %v1059_v5  ;;  %v802_v5 = vunpack.c.l.bf16 %v1492_v8  ;;  %p1262_p1 = scmp.ne.s32.totalorder %s1260_s18, %s1261_s21  ;;  %p1266_p11 = scmp.lt.s32.totalorder %s1260_s18, %s1602_s7 }
  0x44   : > { %377 = vst [vmem:[#allocation2 + $0x8] sm:$0x1] %v376_v36  ;;  %p1267_p2 = scmp.lt.s32.totalorder %s1265_s23, %s1261_s21 }
  0x45   : > { %778 = vmatpush.bf16.msrb.mxu1 %v1064_v60  ;;  %p1263_p4 = pnand %p1262_p1, %p1435_p3 }
  0x46   : > { %v603_v32 = vld [vmem:[#allocation3] sm:$0xf]  ;;  %p1268_p9 = por %p1267_p2, %p1266_p11 }
  0x47   : > { %v1074_v37 = vld [vmem:[#allocation2] sm:$0xf0]  ;;  %721 = vmatpush.bf16.msrb.mxu0 %v1056_v58  ;;  %683 = vmatpush.bf16.msra.mxu3 %v1058_v14  ;;  %p1264_p8 = pneg %p1263_p4 }
  0x49   : > { %779 = vmatpush.bf16.msrb.mxu1 %v1063_v63  ;;  %p1269_p10 = pnand %p1268_p9, %p1264_p8 }
  0x4a   : > { %v1067_v38 = vld [vmem:[#allocation2] sm:$0xff]  }
  0x4b   : > { %v1075_v39 = vld [vmem:[#allocation2] sm:$0xe]  ;;  %v410_v40 = vshll.u32 %v1067_v38, 16  ;;  %966 = vmatmul.msk.bf16.vlgmr.msra.gmra.mxu1 %vm443_vm9, %v1067_v38  ;;  %v388_v41 = vld [vmem:[#allocation2 + $0x8] sm:$0x1]  ;;  %v408_v43 = vshrl.u32 %v1067_v38, 16  ;;  %722 = vmatpush.bf16.msrb.mxu0 %v1055_v59 }
  0x4c   : > { %v1076_v42 = vor.u32 %v1075_v39, %v1074_v37  ;;  %v403_v44 = vunpack.c.l.b16 %v388_v41  ;;  %684 = vmatpush.bf16.msra.mxu3 %v1057_v18  ;;  %v803_v18 = vunpack.c.l.bf16 %v1494_v9 }
  0x4d   : > { %v412_v45 = vrot.slane %v410_v40, 1  ;;  %780 = vmatpush.bf16.msrb.mxu1 %v1062_v12  ;;  %v607_v40 = vld [vmem:[#allocation3 + $0x8] sm:$0x1] }
  0x4e   : > { %v405_v46 = vpack.c.b16 %v403_v44, %v403_v44  ;;  %v515_v47 = vrot.slane %v1076_v42, 1 }
  0x4f   : > { %v413_v48 = vor.u32 %v412_v45, %v408_v43  ;;  %723 = vmatpush.bf16.msrb.mxu0 %v1054_v61 }
  0x50   : > { %v516_v49 = vrot.slane %v405_v46, 1  ;;  %v415_v50 = vshll.u32 %v405_v46, 16 }
  0x51   : > { %781 = vmatpush.bf16.msrb.mxu1 %v1061_v16 }
  0x52   : > { %v517_v51 = vsel %vm514_vm10, %v515_v47, %v516_v49  ;;  %v417_v52 = vrot.slane %v415_v50, 1 }
  0x53   : > { %983 = vmatmul.msk.bf16.vlgmr.msra.gmra.mxu2 %vm443_vm9, %v517_v51  ;;  %724 = vmatpush.bf16.msrb.mxu0 %v1053_v2  ;;  %v1154_v2 = vld [vmem:[%s1601_s6] ss:$0 sm:$0xff] }
  0x54   : > { %v418_v53 = vsel %vm406_vm11, %v413_v48, %v417_v52 }
  0x55   : > { %949 = vmatmul.msk.bf16.vlgmr.msra.gmra.mxu0 %vm443_vm9, %v418_v53 }
  0xc8   : > { %v496_v0 = vpop.f32.mrf.mxu1 }
  0xd0   : > { %v498_v19 = vpop.f32.mrf.mxu1 }
  0xd2   : > { %v456_v1 = vpop.f32.mrf.mxu0 }
  0xd3   : > { %v497_v4 = vadd.f32 %v496_v0, %v456_v1  ;;  %v1153_v0 = vld [vmem:[%s1600_s5] ss:$0 sm:$0xff] }
  0xd6   : > { %v554_v7 = vpop.f32.mrf.mxu2 }
  0xd7   : > { %v559_v10 = vadd.f32 %v554_v7, %v497_v4 }
  0xd9   : > { %v565_v13 = vmul.f32 %v1151_v6, %v559_v10 }
  0xda   : > { %v458_v15 = vpop.f32.mrf.mxu0 }
  0xdb   : > { %v571_v17 = vadd.f32 %v1152_v11, %v565_v13  ;;  %v499_v21 = vadd.f32 %v498_v19, %v458_v15 }
  0xdd   : > { %v573_v20 = vmax.f32 %v571_v17, 0.0 }
  0xde   : > { %v556_v22 = vpop.f32.mrf.mxu2 }
  0xdf   : > { %v581_v24 = vpack.c.bf16 %v573_v20, %v573_v20  ;;  %v560_v25 = vadd.f32 %v556_v22, %v499_v21 }
  0xe1   : > { %v584_v26 = vshrl.u32 %v581_v24, 16  ;;  %v566_v27 = vmul.f32 %v1151_v6, %v560_v25  ;;  %v587_v29 = vshll.u32 %v581_v24, 16 }
  0xe3   : > { %v586_v28 = vrot.slane %v584_v26, 7  ;;  %v572_v30 = vadd.f32 %v1152_v11, %v566_v27 }
  0xe5   : > { %v589_v33 = vor.u32 %v587_v29, %v586_v28  ;;  %v574_v34 = vmax.f32 %v572_v30, 0.0  ;;  %v590_v41 = vrot.slane %v586_v28, 4 }
  0xe7   : > { %v604_v35 = vsel %vm1514_vm8, %v589_v33, %v603_v32  ;;  %v582_v36 = vpack.c.bf16 %v574_v34, %v574_v34 }
  0xe8   : > { %605 = vst [vmem:[#allocation3] sm:$0xf] %v604_v35 }
  0xe9   : > { %v592_v37 = vshrl.u32 %v582_v36, 16  ;;  %v595_v39 = vshll.u32 %v582_v36, 16 }
  0xeb   : > { %v594_v38 = vrot.slane %v592_v37, 7 }
  0xed   : > { %v597_v42 = vor.u32 %v595_v39, %v594_v38  ;;  %v599_v43 = vrot.slane %v594_v38, 4 }
  0xef   : > { %v598_v44 = vsel %vm1506_vm6, %v590_v41, %v597_v42  ;;  %v608_v45 = vsel %vm1483_vm3, %v599_v43, %v607_v40  ;;  %v1078_v49 = vld [vmem:[#allocation3] sm:$0xe] }
  0xf0   : > { %606 = vst.msk [vmem:[#allocation3 + $0x4] sm:$0xf] %vm368_vm7, %v598_v44 }
  0xf1   : > { %609 = vst [vmem:[#allocation3 + $0x8] sm:$0x1] %v608_v45 }
  0xf7   : > { %v1071_v31 = vld [vmem:[#allocation3] sm:$0xff]  }
  0xf8   : > { %v1077_v46 = vld [vmem:[#allocation3] sm:$0xf0]  ;;  %v641_v47 = vshll.u32 %v1071_v31, 16  ;;  %1017 = vmatmul.msk.bf16.vlgmr.msrb.gmra.mxu0 %vm443_vm9, %v1071_v31  ;;  %v620_v48 = vld [vmem:[#allocation3 + $0x8] sm:$0x1]  ;;  %v639_v54 = vshrl.u32 %v1071_v31, 16 }
  0xf9   : > { %v635_v50 = vunpack.c.l.b16 %v620_v48  ;;  %v1079_v51 = vor.u32 %v1078_v49, %v1077_v46 }
  0xfa   : > { %v643_v52 = vrot.slane %v641_v47, 1 }
  0xfb   : > { %v637_v53 = vpack.c.b16 %v635_v50, %v635_v50  ;;  %v744_v23 = vrot.slane %v1079_v51, 1 }
  0xfc   : > { %v644_v57 = vor.u32 %v643_v52, %v639_v54 }
  0xfd   : > { %v745_v55 = vrot.slane %v637_v53, 1  ;;  %v646_v56 = vshll.u32 %v637_v53, 16 }
  0xff   : > { %v746_v3 = vsel %vm514_vm10, %v744_v23, %v745_v55  ;;  %v648_v58 = vrot.slane %v646_v56, 1 }
 0x100   : > { %1034 = vmatmul.msk.bf16.vlgmr.msrb.gmra.mxu1 %vm443_vm9, %v746_v3 }
 0x101   : > { %v649_v59 = vsel %vm406_vm11, %v644_v57, %v648_v58 }
 0x102   : > { %1000 = vmatmul.msk.bf16.vlgmr.msra.gmra.mxu3 %vm443_vm9, %v649_v59 }
 0x175   : > { %v726_v60 = vpop.f32.mrf.mxu0 }
 0x17d   : > { %v783_v61 = vpop.f32.mrf.mxu1  ;;  %v728_v7 = vpop.f32.mrf.mxu0 }
 0x185   : > { %v686_v62 = vpop.f32.mrf.mxu3  ;;  %v785_v13 = vpop.f32.mrf.mxu1 }
 0x186   : > { %v727_v63 = vadd.f32 %v726_v60, %v686_v62 }
 0x188   : > { %v788_v1 = vadd.f32 %v783_v61, %v727_v63 }
 0x18a   : > { %v794_v4 = vmul.f32 %v1153_v0, %v788_v1 }
 0x18c   : > { %v800_v6 = vadd.f32 %v1154_v2, %v794_v4 }
 0x18d   : > { %v688_v10 = vpop.f32.mrf.mxu3 }
 0x18e   : > { %v804_v11 = vadd.f32 %v802_v5, %v800_v6  ;;  %v729_v12 = vadd.f32 %v728_v7, %v688_v10 }
 0x190   : > { %v806_v14 = vmax.f32 %v804_v11, 0.0  ;;  %v789_v15 = vadd.f32 %v785_v13, %v729_v12 }
 0x192   : > { %v808_v16 = vpack.c.bf16 %v806_v14, %v806_v14  ;;  %v795_v17 = vmul.f32 %v1153_v0, %v789_v15 }
 0x194   : > { %v801_v19 = vadd.f32 %v1154_v2, %v795_v17  ;;  %810 = vst.msk [vmem:[%s331_s13] sm:$0xf] %vm368_vm7, %v808_v16 }
 0x196   : > { %v805_v8 = vadd.f32 %v803_v18, %v801_v19 }
 0x198   : > { %v807_v20 = vmax.f32 %v805_v8, 0.0 }
 0x19a   : > { %v809_v21 = vpack.c.bf16 %v807_v20, %v807_v20 }
 0x19c   : > { %811 = vst.msk [vmem:[%s331_s13 + $0x4] sm:$0xf] %vm368_vm7, %v809_v21 }
 0x19d   : > { %1272 = shalt.err (!%p1269_p10)
}
 0x19e   : > { %s1321_s14 = smov 64   ;;  %s1322_s17 = smov 4  }
 0x19f   : > { %1090 = dma.vmem_to_hbm [thread:$0]  (%p1435_p3), %s826_s30, 128, %s828_s12, %s813_s28, %s1321_s14, %s1321_s14, %s1322_s17  }
 0x1a0 PF: > { %s842_s11 = sand.u32 1, %s1303_s24   ;;  %p1622_p12 = scmp.ge.s32.totalorder %s1315_s27, 2 }
 0x1a1   : > { %s843_s20 = scalar_lea.sflag [#allocation6], %s842_s11 }
 0x1a2   : > { %p1104_p13 = pnand %p1622_p12, %p1398_p6 }
 0x1a4   : > { %p1105_p0 = pneg %p1104_p13 }
 0x1a6   : > { %1298 = dma.done.wait (%p1105_p0), %s843_s20, 128  }
 0x1a7   : > { %1300 = vsyncadd (%p1105_p0), %s843_s20, 4294967168  ;;  %p21_p5 = scmp.ge.s32.totalorder %s1425_s22, 4   ;;  %s1623_s24 = smov %s1307_s25 }
 0x1a8   : > { %s1624_s25 = smov %s1311_s26  ;;  %s1625_s26 = smov %s1441_s10 }
 0x1a9   : > { %s1626_s27 = smov %s1425_s22  ;;  %23 = sbr.rel (!%p21_p5) target bundleno = 8 (0x8), region = 105 }
 0x1ae   :  { %849 = vsyncpa [#allocation5], 1 }
 0x1af   :  { %851 = vsyncpa [#allocation5 + $0x1], 1 }
 0x1b0   :  { %852 = vsyncpa [#allocation8], 1 }
 0x1b1   :  { %853 = vsyncpa [#allocation6], 1 }
 0x1b2   :  { %855 = vsyncpa [#allocation6 + $0x1], 1 }

</bundles_post_ra>
